<compile_context>
chip_gen: v6e
topology: v6e:2x2x1
jax: 0.10.0
libtpu: 0.0.40
codegen_flags: <defaults>
</compile_context>

<pallas_src>
import functools

import jax
import jax.numpy as jnp
from jax.experimental import pallas as pl
from jax.experimental.pallas import tpu as pltpu


def _round_up(x: int, m: int) -> int:
    return (x + m - 1) // m * m


# ---------------------------------------------------------------------------
# Kernel bodies.  Grid = (M/tm, N/tn, K/tk), k innermost ("arbitrary").
# ---------------------------------------------------------------------------
def _linear_relu_kernel_f32(x_ref, w_ref, b_ref, o_ref):
    """f32 output: accumulate directly into the resident output block."""
    k = pl.program_id(2)

    @pl.when(k == 0)
    def _():
        o_ref[...] = jnp.zeros_like(o_ref)

    # x tile (tm, tk) @ w tile (tk, tn): plain NN matmul, no rhs transpose.
    o_ref[...] += jnp.dot(x_ref[...], w_ref[...],
                          preferred_element_type=jnp.float32)

    @pl.when(k == pl.num_programs(2) - 1)
    def _():
        o_ref[...] = jnp.maximum(o_ref[...] + b_ref[...], 0.0)


def _linear_relu_kernel_acc(x_ref, w_ref, b_ref, o_ref, acc_ref):
    """Narrow output dtypes (bf16, ...): keep an f32 VMEM accumulator."""
    k = pl.program_id(2)

    @pl.when(k == 0)
    def _():
        acc_ref[...] = jnp.zeros_like(acc_ref)

    acc_ref[...] += jnp.dot(x_ref[...], w_ref[...],
                            preferred_element_type=jnp.float32)

    @pl.when(k == pl.num_programs(2) - 1)
    def _():
        o_ref[...] = jnp.maximum(acc_ref[...] + b_ref[...], 0.0).astype(o_ref.dtype)


# ---------------------------------------------------------------------------
# Wrapper.
# ---------------------------------------------------------------------------
def _vmem_cap_bytes() -> int:
    """Usable VMEM budget: physical capacity minus headroom for compiler scratch."""
    try:
        cap = int(pltpu.get_tpu_info().vmem_capacity_bytes)
    except Exception:
        cap = 64 << 20  # v7x-safe fallback
    return max(32 << 20, min(cap - (8 << 20), (cap * 7) // 8))


def prepare_weight(weight_nk):
    """One-time conversion of a torch-layout (out, in) weight to the (in, out)
    layout consumed by the kernel.  Hoist this out of the per-call path for
    repeated inference so the transpose HBM pass is paid only once."""
    return jnp.swapaxes(jnp.asarray(weight_nk), 0, 1)


@functools.partial(jax.jit, static_argnames=("tm", "tn", "tk", "vmem_cap"))
def _linear_relu_impl(x, w_kn, bias, *, tm, tn, tk, vmem_cap):
    *lead, K = x.shape
    K_w, N = w_kn.shape
    assert K == K_w, (K, K_w)

    x2d = x.reshape(-1, K)
    M = x2d.shape[0]
    out_dtype = x.dtype

    x_b = jnp.dtype(x2d.dtype).itemsize
    w_b = jnp.dtype(w_kn.dtype).itemsize
    o_b = jnp.dtype(out_dtype).itemsize

    # Sublane multiple for the M (second-to-last) dim: 8 f32 / 16 bf16 / 32 i8.
    sub_m = max(8, 32 // x_b)

    # ---- M / N tiles: never pad; Pallas masks the partial edge blocks.
    tm_e = M if M <= tm else _round_up(min(tm, M), sub_m)
    tn_e = N if N <= tn else _round_up(min(tn, N), 128)

    # ---- K tile must divide the (possibly padded) K exactly: garbage along
    # the reduction would corrupt valid outputs (unlike M/N edge garbage).
    if K <= tk:
        tk_e, K_p = K, K
    else:
        base = max(128, (tk // 128) * 128)
        div = 0
        for cand in range(base, 0, -128):
            if K % cand == 0:
                div = cand
                break
        if div >= min(base, 512):
            tk_e, K_p = div, K               # exact divisor, no padding
        else:
            tk_e = base                      # rare pathological K: zero-pad
            K_p = _round_up(K, tk_e)

    # ---- Megacore: ensure the parallel grid has >= 2 output blocks so both
    # v7x TensorCores get work.  Prefer splitting N (each core then streams
    # half the weight); fall back to splitting M.
    if pl.cdiv(M, tm_e) * pl.cdiv(N, tn_e) < 2:
        if N >= 2 * 128:
            tn_e = _round_up(pl.cdiv(N, 2), 128)
        elif M >= 2 * sub_m:
            tm_e = _round_up(pl.cdiv(M, 2), sub_m)

    grid_m = pl.cdiv(M, tm_e)
    grid_n = pl.cdiv(N, tn_e)
    grid_k = K_p // tk_e

    # ---- Zero-pad along K only (compile-time no-op when already exact).
    if K_p != K:
        x2d = jnp.pad(x2d, ((0, 0), (0, K_p - K)))
        w_kn = jnp.pad(w_kn, ((0, K_p - K), (0, 0)))

    if bias is None:
        b2d = jnp.zeros((1, N), jnp.float32)
    else:
        b2d = bias.astype(jnp.float32).reshape(1, N)

    # ---- Weight pipeline depth: skinny-M shapes have little compute per
    # weight tile, so buffer the weight stream 3 deep to hide HBM latency.
    w_bufs = 3 if (tm_e <= 64 and grid_n * grid_k >= 3) else 2
    w_index = lambda i, j, k: (k, j)
    if w_bufs == 3:
        w_spec = pl.BlockSpec((tk_e, tn_e), w_index, pipeline_mode=pl.Buffered(3))
    else:
        w_spec = pl.BlockSpec((tk_e, tn_e), w_index)

    use_acc = out_dtype != jnp.float32
    kernel = _linear_relu_kernel_acc if use_acc else _linear_relu_kernel_f32
    scratch = [pltpu.VMEM((tm_e, tn_e), jnp.float32)] if use_acc else []

    vmem_bytes = (
        2 * tm_e * tk_e * x_b             # x double buffer
        + w_bufs * tk_e * tn_e * w_b      # weight buffers
        + 2 * tm_e * tn_e * o_b           # output double buffer
        + 2 * tn_e * 4                    # bias double buffer
        + (tm_e * tn_e * 4 if use_acc else 0)
    )
    vmem_limit = int(min(max(vmem_bytes + (8 << 20), 32 << 20), vmem_cap))

    cost = pl.CostEstimate(
        flops=2 * M * N * K,
        transcendentals=0,
        bytes_accessed=M * K * x_b + K * N * w_b + M * N * o_b + N * 4,
    )

    out2d = pl.pallas_call(
        kernel,
        out_shape=jax.ShapeDtypeStruct((M, N), out_dtype),
        grid_spec=pltpu.PrefetchScalarGridSpec(
            num_scalar_prefetch=0,
            grid=(grid_m, grid_n, grid_k),
            in_specs=[
                pl.BlockSpec((tm_e, tk_e), lambda i, j, k: (i, k)),  # x  (M, K)
                w_spec,                                              # W  (K, N)
                pl.BlockSpec((1, tn_e), lambda i, j, k: (0, j)),     # b  (1, N)
            ],
            out_specs=pl.BlockSpec((tm_e, tn_e), lambda i, j, k: (i, j)),
            scratch_shapes=scratch,
        ),
        compiler_params=pltpu.CompilerParams(
            dimension_semantics=("parallel", "parallel", "arbitrary"),
            vmem_limit_bytes=vmem_limit,
        ),
        cost_estimate=cost,
    )(x2d, w_kn, b2d)

    return out2d.reshape(*lead, N)


def linear_relu_kn(x, weight_kn, bias, *, tm=None, tn=None, tk=None):
    """Fused Linear+ReLU with a pre-transposed (in_features, out_features) weight."""
    vmem_cap = _vmem_cap_bytes()
    if tm is None:
        tm = 512
    if tn is None:
        # Bigger resident output tiles where VMEM allows (v5e/v6e: 128 MiB).
        tn = 1024 if vmem_cap >= (96 << 20) else 512
    if tk is None:
        tk = 2048
    return _linear_relu_impl(x, weight_kn, bias, tm=int(tm), tn=int(tn),
                             tk=int(tk), vmem_cap=int(vmem_cap))


def linear_relu(x, weight, bias, *, tm=None, tn=None, tk=None):
    """Fused Linear + ReLU matching torch LinearReLU.forward.

    x: (..., in_features); weight: (out_features, in_features); bias: (out_features,)
    The weight transpose here costs one extra HBM pass per call; for repeated
    inference call prepare_weight() once and use linear_relu_kn().
    """
    return linear_relu_kn(x, prepare_weight(weight), bias, tm=tm, tn=tn, tk=tk)


if __name__ == "__main__":
    key = jax.random.PRNGKey(0)
    kx, kw, kb = jax.random.split(key, 3)

    # Small shapes consistent with LinearReLU: (batch, seq, in) -> (batch, seq, out)
    batch, seq, in_features, out_features = 2, 8, 32, 64
    x = jax.random.normal(kx, (batch, seq, in_features), dtype=jnp.float32)
    weight = jax.random.normal(kw, (out_features, in_features), dtype=jnp.float32) * 0.1
    bias = jax.random.normal(kb, (out_features,), dtype=jnp.float32) * 0.1

    out = jax.block_until_ready(linear_relu(x, weight, bias))
    ref = jnp.maximum(jnp.einsum("bsk,nk->bsn", x, weight) + bias, 0.0)
    assert out.shape == (batch, seq, out_features)
    assert jnp.allclose(out, ref, atol=1e-5, rtol=1e-5)

    # Non-divisible shapes exercise the masked edge-block path (no padding),
    # via the pre-transposed-weight entry point.
    k2 = jax.random.PRNGKey(1)
    k2x, k2w, k2b = jax.random.split(k2, 3)
    x2 = jax.random.normal(k2x, (3, 5, 40), dtype=jnp.float32)
    w2 = jax.random.normal(k2w, (200, 40), dtype=jnp.float32) * 0.1
    b2 = jax.random.normal(k2b, (200,), dtype=jnp.float32) * 0.1
    out2 = jax.block_until_ready(linear_relu_kn(x2, prepare_weight(w2), b2))
    ref2 = jnp.maximum(jnp.einsum("bsk,nk->bsn", x2, w2) + b2, 0.0)
    assert out2.shape == (3, 5, 200)
    assert jnp.allclose(out2, ref2, atol=1e-5, rtol=1e-5)

    print("KERNEL_OK")
</pallas_src>

<mosaic_0001>
module attributes {stable_mosaic.version = 11 : i64} {
  func.func @_linear_relu_kernel_f32(%arg0: i32, %arg1: i32, %arg2: i32, %arg3: memref<8x32xf32, #tpu.memory_space<vmem>>, %arg4: memref<32x64xf32, #tpu.memory_space<vmem>>, %arg5: memref<1x64xf32, #tpu.memory_space<vmem>>, %arg6: memref<8x64xf32, #tpu.memory_space<vmem>>) attributes {dimension_semantics = [#tpu.dimension_semantics<parallel>, #tpu.dimension_semantics<parallel>, #tpu.dimension_semantics<arbitrary>], iteration_bounds = array<i64: 2, 1, 1>, scalar_prefetch = 0 : i64, scratch_operands = 0 : i64, tpu.core_type = #tpu.core_type<tc>, window_params = [{transform_indices = @transform_0, window_bounds = array<i64: 8, 32>}, {transform_indices = @transform_1, window_bounds = array<i64: 32, 64>}, {transform_indices = @transform_2, window_bounds = array<i64: 1, 64>}, {transform_indices = @transform_3, window_bounds = array<i64: 8, 64>}]} {
    %c0_i32 = arith.constant 0 : i32
    %0 = arith.cmpi eq, %arg2, %c0_i32 : i32
    %1 = arith.extui %0 : i1 to i32
    %c0_i32_0 = arith.constant 0 : i32
    %2 = arith.cmpi ne, %1, %c0_i32_0 : i32
    scf.if %2 {
      %cst_10 = arith.constant 0.000000e+00 : f32
      %12 = vector.broadcast %cst_10 : f32 to vector<8x64xf32>
      %c0_11 = arith.constant 0 : index
      %c0_12 = arith.constant 0 : index
      %13 = vector.load %arg6[%c0_11, %c0_12] : memref<8x64xf32, #tpu.memory_space<vmem>>, vector<8x64xf32>
      tpu.vector_store %arg6[%c0_11, %c0_12], %12 {strides = array<i32>} : memref<8x64xf32, #tpu.memory_space<vmem>>, vector<8x64xf32>,
    } else {
    }
    %c0 = arith.constant 0 : index
    %c0_1 = arith.constant 0 : index
    %3 = vector.load %arg6[%c0, %c0_1] : memref<8x64xf32, #tpu.memory_space<vmem>>, vector<8x64xf32>
    %c0_2 = arith.constant 0 : index
    %c0_3 = arith.constant 0 : index
    %4 = vector.load %arg3[%c0_2, %c0_3] : memref<8x32xf32, #tpu.memory_space<vmem>>, vector<8x32xf32>
    %c0_4 = arith.constant 0 : index
    %c0_5 = arith.constant 0 : index
    %5 = vector.load %arg4[%c0_4, %c0_5] : memref<32x64xf32, #tpu.memory_space<vmem>>, vector<32x64xf32>
    %cst = arith.constant dense<0.000000e+00> : vector<8x64xf32>
    %6 = tpu.matmul %4, %5, %cst {dimension_numbers = #tpu.dot_dimension_numbers<[1], [0], [0], [1], [0, 0, 1, 1], [], []>} : vector<8x32xf32>, vector<32x64xf32>, vector<8x64xf32> -> vector<8x64xf32>
    %7 = arith.addf %3, %6 : vector<8x64xf32>
    %c0_6 = arith.constant 0 : index
    %c0_7 = arith.constant 0 : index
    %8 = vector.load %arg6[%c0_6, %c0_7] : memref<8x64xf32, #tpu.memory_space<vmem>>, vector<8x64xf32>
    tpu.vector_store %arg6[%c0_6, %c0_7], %7 {strides = array<i32>} : memref<8x64xf32, #tpu.memory_space<vmem>>, vector<8x64xf32>,
    %c0_i32_8 = arith.constant 0 : i32
    %9 = arith.cmpi eq, %arg2, %c0_i32_8 : i32
    %10 = arith.extui %9 : i1 to i32
    %c0_i32_9 = arith.constant 0 : i32
    %11 = arith.cmpi ne, %10, %c0_i32_9 : i32
    scf.if %11 {
      %c0_10 = arith.constant 0 : index
      %c0_11 = arith.constant 0 : index
      %12 = vector.load %arg6[%c0_10, %c0_11] : memref<8x64xf32, #tpu.memory_space<vmem>>, vector<8x64xf32>
      %c0_12 = arith.constant 0 : index
      %c0_13 = arith.constant 0 : index
      %13 = vector.load %arg5[%c0_12, %c0_13] : memref<1x64xf32, #tpu.memory_space<vmem>>, vector<1x64xf32>
      %14 = vector.broadcast %13 : vector<1x64xf32> to vector<8x64xf32>
      %15 = arith.addf %12, %14 : vector<8x64xf32>
      %cst_14 = arith.constant 0.000000e+00 : f32
      %16 = vector.broadcast %cst_14 : f32 to vector<8x64xf32>
      %17 = arith.maximumf %15, %16 : vector<8x64xf32>
      %c0_15 = arith.constant 0 : index
      %c0_16 = arith.constant 0 : index
      %18 = vector.load %arg6[%c0_15, %c0_16] : memref<8x64xf32, #tpu.memory_space<vmem>>, vector<8x64xf32>
      tpu.vector_store %arg6[%c0_15, %c0_16], %17 {strides = array<i32>} : memref<8x64xf32, #tpu.memory_space<vmem>>, vector<8x64xf32>,
    } else {
    }
    return
  }
  func.func @transform_0(%arg0: i32, %arg1: i32, %arg2: i32) -> (i32, i32) {
    %c0_i32 = arith.constant 0 : i32
    return %arg0, %arg2 : i32, i32
  }
  func.func @transform_1(%arg0: i32, %arg1: i32, %arg2: i32) -> (i32, i32) {
    %c0_i32 = arith.constant 0 : i32
    return %arg2, %arg1 : i32, i32
  }
  func.func @transform_2(%arg0: i32, %arg1: i32, %arg2: i32) -> (i32, i32) {
    %c0_i32 = arith.constant 0 : i32
    %c0_i32_0 = arith.constant 0 : i32
    return %c0_i32, %arg1 : i32, i32
  }
  func.func @transform_3(%arg0: i32, %arg1: i32, %arg2: i32) -> (i32, i32) {
    %c0_i32 = arith.constant 0 : i32
    return %arg0, %arg1 : i32, i32
  }
}

</mosaic_0001>

<bundles_post_ra>
// kernel: _linear_relu_impl.1
= control target key start
LH: loop header
LB: loop body
LE: loop exit
PB: predicated region body
PF: predicated region fallthrough
CT: control target
= control target key end

     0   :  { %8 = vsyncpa [#allocation3], 0  ;;  %s929_s0 = inlined_call_operand.hbm [shape: f32[16,32], index: 0, kind: input, shape index: {}]   ;;  %s930_s1 = inlined_call_operand.hbm [shape: f32[32,64], index: 1, kind: input, shape index: {}]   ;;  %s931_s2 = inlined_call_operand.vmem [shape: f32[1,64], index: 2, kind: input, shape index: {}]   ;;  %s932_s3 = inlined_call_operand.hbm [shape: f32[16,64], index: 3, kind: output, shape index: {}]  }
   0x1   :  { %10 = vsyncpa [#allocation3 + $0x1], 0 }
   0x2   :  { %11 = vsyncpa [#allocation6], 0 }
   0x3   :  { %12 = vsyncpa [#allocation4], 0 }
   0x4   :  { %14 = vsyncpa [#allocation4 + $0x1], 0  ;;  %s756_s12 = smov 0   ;;  %s758_s13 = smov 0  }
   0x5   :  { %s760_s14 = smov 0   ;;  %s762_s15 = smov 0  }
   0x6   :  { %s764_s16 = smov 0   ;;  %s766_s17 = smov 0  }
   0x7 LB: > { %s478_s18 = sadd.s32 4294967295, %s727_s17   ;;  %s479_s19 = sadd.s32 4294967294, %s727_s17   ;;  %s727_s17 = sphi %s766_s17, %s20_s17   ;;  %s723_s16 = sphi %s764_s16, %s950_s16   ;;  %s719_s15 = sphi %s762_s15, %s949_s15   ;;  %s715_s14 = sphi %s760_s14, %s948_s14   ;;  %s711_s13 = sphi %s758_s13, %s947_s13   ;;  %s707_s12 = sphi %s756_s12, %s946_s12  }
   0x8   : > { %p61_p0 = scmp.ne.s32.totalorder %s711_s13, %s707_s12  ;;  %p790_p1 = scmp.eq.s32.totalorder %s478_s18, 0 }
   0x9   : > { %p794_p2 = scmp.eq.s32.totalorder %s478_s18, 1  ;;  %p147_p3 = scmp.eq.s32.totalorder %s479_s19, 1 }
   0xa   : > { %p800_p4 = por %p790_p1, %p61_p0  ;;  %p480_p5 = scmp.ge.s32.totalorder %s727_s17, 1 }
   0xb   : > { %p805_p6 = por %p147_p3, %p61_p0  ;;  %p154_p7 = scmp.lt.s32.totalorder %s727_s17, 3 }
   0xc   : > { %s936_s22 = scalar_select %p800_p4, 1, 0 }
   0xd   : > { %s937_s23 = scalar_select %p805_p6, 1, 0 }
   0xe   : > { %p810_p8 = pnand %p480_p5, %p154_p7  ;;  %s729_s25 = smov [#allocation5]  }
   0xf   : > { %s170_s26 = sshll.u32 %s729_s25, 4  ;;  %s39_s28 = sadd.s32 1, %s723_s16  ;;  %s171_s26 = int_to_ptr.vmem [resolvable:$true] %s170_s26 }
  0x10   : > { %p520_p9 = pneg %p810_p8  ;;  %s600_s29 = scalar_lea.vmem %s171_s26, 512 }
  0x11   : > { %p601_p13 = scmp.ne.s32.totalorder %s171_s26, %s600_s29  ;;  %p608_p5 = scmp.lt.s32.totalorder %s171_s26, %s171_s26 }
  0x12   : > { %p819_p11 = pnand %p520_p9, %p790_p1  ;;  %p609_p7 = scmp.lt.s32.totalorder %s600_s29, %s600_s29 }
  0x14   : > { %p591_p12 = pneg %p819_p11  ;;  %p610_p6 = por %p609_p7, %p608_p5 }
  0x16   : > { %p603_p0 = pnand %p601_p13, %p591_p12 }
  0x18   : > { %p604_p3 = pneg %p603_p0 }
  0x1a   : > { %p611_p4 = pnand %p610_p6, %p604_p3 }
  0x1c   : > { %614 = shalt.err (!%p611_p4)
}
  0x1d   : > { %s730_s30 = smov 128   ;;  %s731_s4 = smov 8  }
  0x1e   : > { %523 = dma.hbm_to_vmem [thread:$0]  (!%p819_p11), %s930_s1, 512, %s171_s26, [#allocation6], %s730_s30, %s730_s30, %s731_s4  }
  0x1f   : > { %p41_p6 = scmp.ge.s32.totalorder %s39_s28, 2  ;;  %s48_s7 = sadd.s32 1, %s715_s14 }
  0x20   : > { %p55_p4 = scmp.ne.s32.totalorder %s715_s14, %s711_s13  ;;  %p56_p9 = scmp.eq.s32.totalorder %s727_s17, 0 }
  0x21   : > { %s952_s28 = smov (%p41_p6, %s39_s28), 0  ;;  %p533_p0 = scmp.lt.s32.totalorder %s727_s17, 2 }
  0x22   : > { %p837_p12 = por %p56_p9, %p55_p4  ;;  %p843_p13 = por %p794_p2, %p55_p4 }
  0x23   : > { %s43_s10 = ssub.s32 %s723_s16, %s952_s28  ;;  %s190_s11 = sand.u32 1, %s715_s14  }
  0x24   : > { %p46_p11 = scmp.eq.s32.totalorder %s43_s10, 0  ;;  %s484_s18 = sshll.u32 %s190_s11, 3 }
  0x25   : > { %s485_s25 = sshll.u32 %s723_s16, 7  ;;  %s194_s30 = scalar_lea.vmem [#allocation2], %s484_s18 }
  0x26   : > { %s852_s19 = scalar_select %p46_p11, %s715_s14, %s48_s7  }
  0x27   : > { %s200_s29 = scalar_lea.hbm %s929_s0, %s485_s25  ;;  %s202_s4 = sshll.u32 %s194_s30, 4  ;;  %s203_s4 = int_to_ptr.vmem [resolvable:$true] %s202_s4 }
  0x28   : > { %p860_p2 = pnand %p533_p0, %p837_p12  ;;  %s191_s5 = scalar_lea.sflag [#allocation3], %s190_s11 }
  0x29   : > { %s628_s6 = scalar_lea.vmem %s203_s4, 128  ;;  %s732_s7 = smov [#allocation2]  }
  0x2a   : > { %p617_p3 = pneg %p860_p2  ;;  %p629_p5 = scmp.ne.s32.totalorder %s203_s4, %s628_s6 }
  0x2b   : > { %s633_s10 = sshll.u32 %s732_s7, 4  ;;  %s634_s10 = int_to_ptr.vmem [resolvable:$false] %s633_s10 }
  0x2c   : > { %p631_p7 = pnand %p629_p5, %p617_p3  ;;  %s635_s25 = scalar_lea.vmem %s634_s10, 256 }
  0x2d   : > { %p636_p4 = scmp.lt.s32.totalorder %s203_s4, %s634_s10  ;;  %p637_p9 = scmp.lt.s32.totalorder %s635_s25, %s628_s6 }
  0x2e   : > { %p632_p6 = pneg %p631_p7 }
  0x2f   : > { %p638_p11 = por %p637_p9, %p636_p4 }
  0x31   : > { %p639_p10 = pnand %p638_p11, %p632_p6 }
  0x33   : > { %642 = shalt.err (!%p639_p10)
}
  0x34   : > { %527 = dma.hbm_to_vmem [thread:$0]  (!%p860_p2), %s200_s29, 128, %s203_s4, %s191_s5  }
  0x35   : > { %211 = sbr.rel (%p810_p8) target bundleno = 290 (0x122), region = 32  ;;  %s871_s8 = sand.u32 (!%p810_p8), 1, %s711_s13  }
  0x36   : > { %s487_s11 = sshll.u32 (!%p810_p8), %s871_s8, 3  ;;  %s214_s18 = scalar_lea.sflag (!%p810_p8), [#allocation3], %s871_s8 }
  0x37   : > { %s217_s26 = scalar_lea.vmem (!%p810_p8), [#allocation2], %s487_s11  ;;  %p943_p12 = scmp.ne.s32.totalorder (!%p810_p8), %s936_s22, 0 }
  0x3a   : > { %694 = dma.done.wait (%p943_p12), %s214_s18, 128  }
  0x3b   : > { %696 = vsyncadd (%p943_p12), %s214_s18, 4294967168 }
  0x3c   : > { %698 = dma.done.wait (%p790_p1), [#allocation6], 512  }
  0x3d   : > { %700 = vsyncadd (%p790_p1), [#allocation6], 4294966784  ;;  %v733_v0 = vmov 0.0   ;;  %vm734_vm0 = vmmov 0   ;;  %vm255_vm1 = vcmask 523264   ;;  %s246_s24 = scalar_lea.vmem [#allocation7], %s487_s11 }
  0x3e   : > { %501 = vmatprep.subr.mxu0 %v733_v0  ;;  %509 = vmatprep.mubr.msk.f32.mxu0 %vm734_vm0, %v733_v0  ;;  %256 = vst.msk [vmem:[%s246_s24] sm:$0xff] %vm255_vm1, %v733_v0  ;;  %v262_v1 = vld [vmem:[#allocation5 + $0x18] sm:$0xff]  ;;  %v261_v2 = vld [vmem:[#allocation5 + $0x10] sm:$0xff]  ;;  %v260_v3 = vld [vmem:[#allocation5 + $0x8] sm:$0xff]  ;;  %vm263_vm2 = vcmask 261120   ;;  %s493_s27 = sshll.u32 %s719_s15, 7 }
  0x3f   : > { %502 = vmatpush3.msra.mxu0 %v262_v1  ;;  %v259_v4 = vld [vmem:[#allocation5] sm:$0xff]  ;;  %v258_v5 = vld [vmem:[%s217_s26] sm:$0xff]  ;;  %s369_s29 = sshll.u32 %s246_s24, 4  ;;  %s367_s21 = scalar_lea.hbm %s932_s3, %s493_s27  ;;  %s370_s29 = int_to_ptr.vmem [resolvable:$true] %s369_s29 }
  0x40   : > { %503 = vmatprep.subr.mxu0 %v733_v0  ;;  %v491_v10 = vld [vmem:[%s931_s2] ss:$0 sm:$0xff]  ;;  %s355_s5 = scalar_lea.sflag [#allocation4], %s871_s8  ;;  %s643_s6 = scalar_lea.vmem %s370_s29, 128 }
  0x41   : > { %504 = vmatpush3.msra.mxu0 %v261_v2  ;;  %p644_p1 = scmp.ne.s32.totalorder %s370_s29, %s643_s6  ;;  %s735_s7 = smov [#allocation7]  }
  0x42   : > { %505 = vmatprep.subr.mxu0 %v733_v0  ;;  %s647_s10 = sshll.u32 %s735_s7, 4  ;;  %s648_s10 = int_to_ptr.vmem [resolvable:$false] %s647_s10 }
  0x43   : > { %506 = vmatpush3.msra.mxu0 %v260_v3  ;;  %p645_p8 = pnand %p644_p1, %p843_p13  ;;  %s649_s15 = scalar_lea.vmem %s648_s10, 256 }
  0x44   : > { %507 = vmatprep.subr.mxu0 %v733_v0  ;;  %p650_p0 = scmp.lt.s32.totalorder %s370_s29, %s648_s10  ;;  %p651_p2 = scmp.lt.s32.totalorder %s649_s15, %s643_s6 }
  0x45   : > { %508 = vmatpush3.msra.mxu0 %v259_v4  ;;  %v257_v6 = vld [vmem:[%s246_s24] sm:$0xff]  ;;  %p646_p10 = pneg %p645_p8 }
  0x46   : > { %510 = vmatmul.mubr.msk.f32.vlgmr.msra.gmra.mxu0 %vm263_vm2, %v258_v5  ;;  %p652_p3 = por %p651_p2, %p650_p0 }
  0x48   : > { %p653_p5 = pnand %p652_p3, %p646_p10 }
 0x106   : > { %v333_v7 = vpop.f32.mrf.mxu0 }
 0x107   : > { %v337_v8 = vadd.f32 %v333_v7, %v257_v6 }
 0x108   : > { %v511_v9 = vpop.f32.mrf.mxu0 }
 0x109   : > { %339 = vst.msk [vmem:[%s246_s24] sm:$0xff] %vm255_vm1, %v337_v8 }
 0x110   : > { %v343_v11 = vld [vmem:[%s246_s24] sm:$0xff] }
 0x111   : > { %v351_v12 = vadd.f32 %v491_v10, %v343_v11 }
 0x113   : > { %v352_v13 = vmax.f32 %v351_v12, 0.0 }
 0x115   : > { %353 = vst.msk [vmem:[%s246_s24] sm:$0xff] %vm255_vm1, %v352_v13 }
 0x116   : > { %656 = shalt.err (!%p653_p5)
}
 0x117   : > { %s657_s25 = scalar_lea.hbm %s367_s21, 128  ;;  %s661_s18 = scalar_lea.hbm %s932_s3, 256 }
 0x118   : > { %p658_p7 = scmp.ne.s32.totalorder %s367_s21, %s657_s25  ;;  %p662_p9 = scmp.lt.s32.totalorder %s367_s21, %s932_s3 }
 0x119   : > { %p663_p11 = scmp.lt.s32.totalorder %s661_s18, %s657_s25 }
 0x11a   : > { %p659_p6 = pnand %p658_p7, %p843_p13 }
 0x11b   : > { %p664_p12 = por %p663_p11, %p662_p9 }
 0x11c   : > { %p660_p4 = pneg %p659_p6 }
 0x11e   : > { %p665_p1 = pnand %p664_p12, %p660_p4 }
 0x120   : > { %668 = shalt.err (!%p665_p1)
}
 0x121   : > { %518 = dma.vmem_to_hbm [thread:$0]  (%p843_p13), %s370_s29, 128, %s367_s21, %s355_s5  }
 0x122 PF: > { %s381_s20 = sand.u32 1, %s707_s12   ;;  %p944_p8 = scmp.ne.s32.totalorder %s937_s23, 0 }
 0x123   : > { %p945_p10 = scmp.ge.s32.totalorder %s727_s17, 2  ;;  %s382_s22 = scalar_lea.sflag [#allocation4], %s381_s20 }
 0x125   : > { %p529_p0 = pnand %p945_p10, %p944_p8 }
 0x127   : > { %p530_p2 = pneg %p529_p0 }
 0x129   : > { %702 = dma.done.wait (%p530_p2), %s382_s22, 128  }
 0x12a   : > { %704 = vsyncadd (%p530_p2), %s382_s22, 4294967168  ;;  %s20_s17 = sadd.s32 1, %s727_s17   ;;  %s946_s12 = smov %s711_s13 }
 0x12b   : > { %p17_p3 = scmp.ge.s32.totalorder %s20_s17, 4   ;;  %s947_s13 = smov %s715_s14 }
 0x12c   : > { %s948_s14 = smov %s852_s19  ;;  %s949_s15 = smov %s723_s16 }
 0x12d   : > { %s950_s16 = smov %s952_s28  ;;  %19 = sbr.rel (!%p17_p3) target bundleno = 7 (0x7), region = 93 }
 0x132   :  { %387 = vsyncpa [#allocation3], 1 }
 0x133   :  { %389 = vsyncpa [#allocation3 + $0x1], 1 }
 0x134   :  { %390 = vsyncpa [#allocation6], 1 }
 0x135   :  { %391 = vsyncpa [#allocation4], 1 }
 0x136   :  { %393 = vsyncpa [#allocation4 + $0x1], 1 }

</bundles_post_ra>
